<compile_context>
chip_gen: v6e
topology: v6e:2x2x1
jax: 0.10.0
libtpu: 0.0.40
codegen_flags: <defaults>
</compile_context>

<pallas_src>
import jax
import jax.numpy as jnp
from jax.experimental import pallas as pl
from jax.experimental.pallas import tpu as pltpu


def _vcritic_kernel(x_ref, w1t_ref, b1_ref, w2t_ref, b2_ref, w3_ref, b3_ref, o_ref):
    # x stays in its HBM layout (tile, D); the flip to features-on-sublanes /
    # batch-on-lanes happens inside the MXU op below.
    x = x_ref[...]                                            # (tile, D) f32

    # Layer 1: (H1, tile) = W1^T @ x^T, contracting over D (last dim of both
    # operands -> 'md,nd->mn', the standard NT matmul the MXU handles).
    h1 = jnp.tanh(
        jax.lax.dot_general(
            w1t_ref[...], x,                                  # (H1, D) x (tile, D)
            dimension_numbers=(((1,), (1,)), ((), ())),
            preferred_element_type=jnp.float32,
        )
        + b1_ref[...]                                         # (H1, 1) broadcast over lanes
    )

    # Layer 2: (H2, tile)
    h2 = jnp.tanh(
        jnp.dot(w2t_ref[...], h1, preferred_element_type=jnp.float32)
        + b2_ref[...]                                         # (H2, 1)
    )

    # Output layer (out_dim == 1): VPU multiply + sublane (XLU) reduce instead
    # of an M=1 MXU pass -> lane-dense (1, tile) result.
    out = jnp.sum(h2 * w3_ref[...], axis=0, keepdims=True) + b3_ref[...]
    o_ref[...] = out.astype(o_ref.dtype)                      # (1, tile), full vst


def _round_up(n, m):
    return ((n + m - 1) // m) * m


def _cdiv(a, b):
    return -(-a // b)


def vcritic_forward(state, params, *, tile_b=8192):
    """state: (B, D) float32. params: dict of W1,b1,W2,b2,W3,b3. Returns (B, 1)."""
    B, D = state.shape
    W1, b1 = params["W1"], params["b1"]
    W2, b2 = params["W2"], params["b2"]
    W3, b3 = params["W3"], params["b3"]
    H1 = W1.shape[1]
    H2 = W2.shape[1]

    # Weights pre-arranged (tiny, one-time) for the batch-on-lanes dataflow.
    # Note the big `state` tensor is NOT touched here (no extra HBM pass); if
    # the upstream producer emits bf16 state it can be passed straight through.
    w1t = W1.T.astype(jnp.float32)            # (H1, D)
    w2t = W2.T.astype(jnp.float32)            # (H2, H1)
    w3c = W3.reshape(H2, 1).astype(jnp.float32)
    b1c = b1.reshape(H1, 1).astype(jnp.float32)
    b2c = b2.reshape(H2, 1).astype(jnp.float32)
    b3c = b3.reshape(1, 1).astype(jnp.float32)

    # --- adaptive batch tiling ---------------------------------------------
    #  * tile is a multiple of 128 (lane-dense output, MXU alignment)
    #  * choose the number of steps first, then the tile, to minimize padding
    #  * force >= 2 grid steps when B allows so "parallel" shards across both
    #    v7x TensorCores (harmless on single-TC v5e/v6e)
    #  * cap tile so the padded VMEM footprint -- the (tile, D) f32 x block
    #    pads to (tile, 128) = tile*512 B per double-buffered slot -- stays
    #    well under v7x's 32 MiB scoped default.
    max_tile = 16384
    tile_b = max(128, min(tile_b, max_tile))
    num_steps = _cdiv(B, tile_b)
    if num_steps < 2 and B > 128:
        num_steps = 2
    tile = _round_up(_cdiv(B, num_steps), 128)
    num_steps = _cdiv(B, tile)
    B_pad = num_steps * tile

    if B_pad != B:
        # Padded rows produce garbage values through tanh(b1)/tanh(b2); they
        # are sliced off below and must never be consumed downstream.
        state = jnp.pad(state, ((0, B_pad - B), (0, 0)))

    const = lambda shape: pl.BlockSpec(shape, lambda i: tuple(0 for _ in shape))
    in_specs = [
        pl.BlockSpec((tile, D), lambda i: (i, 0)),   # x tile (batch-tiled)
        const((H1, D)), const((H1, 1)),              # layer 1
        const((H2, H1)), const((H2, 1)),             # layer 2
        const((H2, 1)), const((1, 1)),               # output layer
    ]
    # Lane-dense output: batch on the lane axis, one row per pallas_call.
    out_specs = pl.BlockSpec((1, tile), lambda i: (0, i))

    cost = pl.CostEstimate(
        flops=2 * B_pad * (D * H1 + H1 * H2 + H2),
        transcendentals=B_pad * (H1 + H2),
        bytes_accessed=4 * (B_pad * D + B_pad
                            + D * H1 + H1 + H1 * H2 + H2 + H2 + 1),
    )

    out = pl.pallas_call(
        _vcritic_kernel,
        out_shape=jax.ShapeDtypeStruct((1, B_pad), jnp.float32),
        grid_spec=pltpu.PrefetchScalarGridSpec(
            num_scalar_prefetch=0,
            grid=(num_steps,),
            in_specs=in_specs,
            out_specs=out_specs,
        ),
        compiler_params=pltpu.CompilerParams(
            dimension_semantics=("parallel",),        # batch axis shards across TCs
        ),
        cost_estimate=cost,
    )(state, w1t, b1c, w2t, b2c, w3c, b3c)

    return out.reshape(B_pad, 1)[:B]


def _normc_init(key, in_dim, out_dim):
    # normc_init: gaussian weights, each output column normalized to unit L2 norm.
    w = jax.random.normal(key, (in_dim, out_dim), dtype=jnp.float32)
    w = w / jnp.sqrt(jnp.sum(jnp.square(w), axis=0, keepdims=True))
    return w


def make_vcritic_params(key, dim_state, hidden_dims):
    dims = [dim_state] + list(hidden_dims) + [1]
    params = {}
    keys = jax.random.split(key, len(dims) - 1)
    for li, (d_in, d_out) in enumerate(zip(dims[:-1], dims[1:]), start=1):
        params[f"W{li}"] = _normc_init(keys[li - 1], d_in, d_out)
        params[f"b{li}"] = jnp.zeros((1, d_out), dtype=jnp.float32)  # constant-0 bias init
    return params


def vcritic_reference(state, params):
    h = jnp.tanh(state @ params["W1"] + params["b1"])
    h = jnp.tanh(h @ params["W2"] + params["b2"])
    return h @ params["W3"] + params["b3"]


if __name__ == "__main__":
    key = jax.random.PRNGKey(0)
    k_state, k_params = jax.random.split(key)

    B, DIM_STATE = 200, 16          # ragged batch exercises padding + 2-step grid
    HIDDEN_DIMS = [32, 32]

    state = jax.random.normal(k_state, (B, DIM_STATE), dtype=jnp.float32)
    params = make_vcritic_params(k_params, DIM_STATE, HIDDEN_DIMS)

    out = vcritic_forward(state, params)    # tile=128, 2 grid steps, B_pad=256
    out = jax.block_until_ready(out)

    ref = vcritic_reference(state, params)
    assert out.shape == (B, 1)
    # f32 operands -> error is typically ~1e-5; tolerance kept conservative for
    # generations whose default f32 matmul uses reduced-precision MXU passes.
    err = float(jnp.max(jnp.abs(out - ref)))
    assert err < 5e-2, err

    print("KERNEL_OK")
</pallas_src>

<mosaic_0001>
module attributes {stable_mosaic.version = 11 : i64} {
  func.func @_vcritic_kernel(%arg0: i32, %arg1: memref<128x16xf32, #tpu.memory_space<vmem>>, %arg2: memref<32x16xf32, #tpu.memory_space<vmem>>, %arg3: memref<32x1xf32, #tpu.memory_space<vmem>>, %arg4: memref<32x32xf32, #tpu.memory_space<vmem>>, %arg5: memref<32x1xf32, #tpu.memory_space<vmem>>, %arg6: memref<32x1xf32, #tpu.memory_space<vmem>>, %arg7: memref<1x1xf32, #tpu.memory_space<vmem>>, %arg8: memref<1x128xf32, #tpu.memory_space<vmem>>) attributes {dimension_semantics = [#tpu.dimension_semantics<parallel>], iteration_bounds = array<i64: 2>, scalar_prefetch = 0 : i64, scratch_operands = 0 : i64, tpu.core_type = #tpu.core_type<tc>, window_params = [{transform_indices = @transform_0, window_bounds = array<i64: 128, 16>}, {pipeline_mode = #tpu.pipeline_mode<synchronous>, transform_indices = @transform_1, window_bounds = array<i64: 32, 16>}, {pipeline_mode = #tpu.pipeline_mode<synchronous>, transform_indices = @transform_2, window_bounds = array<i64: 32, 1>}, {pipeline_mode = #tpu.pipeline_mode<synchronous>, transform_indices = @transform_3, window_bounds = array<i64: 32, 32>}, {pipeline_mode = #tpu.pipeline_mode<synchronous>, transform_indices = @transform_4, window_bounds = array<i64: 32, 1>}, {pipeline_mode = #tpu.pipeline_mode<synchronous>, transform_indices = @transform_5, window_bounds = array<i64: 32, 1>}, {pipeline_mode = #tpu.pipeline_mode<synchronous>, transform_indices = @transform_6, window_bounds = array<i64: 1, 1>}, {transform_indices = @transform_7, window_bounds = array<i64: 1, 128>}]} {
    %c0 = arith.constant 0 : index
    %c0_0 = arith.constant 0 : index
    %0 = vector.load %arg1[%c0, %c0_0] : memref<128x16xf32, #tpu.memory_space<vmem>>, vector<128x16xf32>
    %c0_1 = arith.constant 0 : index
    %c0_2 = arith.constant 0 : index
    %1 = vector.load %arg2[%c0_1, %c0_2] : memref<32x16xf32, #tpu.memory_space<vmem>>, vector<32x16xf32>
    %cst = arith.constant dense<0.000000e+00> : vector<32x128xf32>
    %2 = tpu.matmul %1, %0, %cst {dimension_numbers = #tpu.dot_dimension_numbers<[1], [1], [0], [0], [0, 0, 1, 0], [], []>} : vector<32x16xf32>, vector<128x16xf32>, vector<32x128xf32> -> vector<32x128xf32>
    %c0_3 = arith.constant 0 : index
    %c0_4 = arith.constant 0 : index
    %3 = vector.load %arg3[%c0_3, %c0_4] : memref<32x1xf32, #tpu.memory_space<vmem>>, vector<32x1xf32>
    %4 = vector.broadcast %3 : vector<32x1xf32> to vector<32x128xf32>
    %5 = arith.addf %2, %4 : vector<32x128xf32>
    %6 = math.tanh %5 : vector<32x128xf32>
    %c0_5 = arith.constant 0 : index
    %c0_6 = arith.constant 0 : index
    %7 = vector.load %arg4[%c0_5, %c0_6] : memref<32x32xf32, #tpu.memory_space<vmem>>, vector<32x32xf32>
    %cst_7 = arith.constant dense<0.000000e+00> : vector<32x128xf32>
    %8 = tpu.matmul %7, %6, %cst_7 {dimension_numbers = #tpu.dot_dimension_numbers<[1], [0], [0], [1], [0, 0, 1, 1], [], []>} : vector<32x32xf32>, vector<32x128xf32>, vector<32x128xf32> -> vector<32x128xf32>
    %c0_8 = arith.constant 0 : index
    %c0_9 = arith.constant 0 : index
    %9 = vector.load %arg5[%c0_8, %c0_9] : memref<32x1xf32, #tpu.memory_space<vmem>>, vector<32x1xf32>
    %10 = vector.broadcast %9 : vector<32x1xf32> to vector<32x128xf32>
    %11 = arith.addf %8, %10 : vector<32x128xf32>
    %12 = math.tanh %11 : vector<32x128xf32>
    %c0_10 = arith.constant 0 : index
    %c0_11 = arith.constant 0 : index
    %13 = vector.load %arg6[%c0_10, %c0_11] : memref<32x1xf32, #tpu.memory_space<vmem>>, vector<32x1xf32>
    %14 = vector.broadcast %13 : vector<32x1xf32> to vector<32x128xf32>
    %15 = arith.mulf %12, %14 : vector<32x128xf32>
    %cst_12 = arith.constant dense<0.000000e+00> : vector<128xf32>
    %16 = vector.multi_reduction <add>, %15, %cst_12 [0] : vector<32x128xf32> to vector<128xf32>
    %17 = vector.shape_cast %16 : vector<128xf32> to vector<1x128xf32>
    %c0_13 = arith.constant 0 : index
    %c0_14 = arith.constant 0 : index
    %18 = vector.load %arg7[%c0_13, %c0_14] : memref<1x1xf32, #tpu.memory_space<vmem>>, vector<1x1xf32>
    %19 = vector.broadcast %18 : vector<1x1xf32> to vector<1x128xf32>
    %20 = arith.addf %17, %19 : vector<1x128xf32>
    %c0_15 = arith.constant 0 : index
    %c0_16 = arith.constant 0 : index
    %21 = vector.load %arg8[%c0_15, %c0_16] : memref<1x128xf32, #tpu.memory_space<vmem>>, vector<1x128xf32>
    tpu.vector_store %arg8[%c0_15, %c0_16], %20 {strides = array<i32>} : memref<1x128xf32, #tpu.memory_space<vmem>>, vector<1x128xf32>,
    return
  }
  func.func @transform_0(%arg0: i32) -> (i32, i32) {
    %c0_i32 = arith.constant 0 : i32
    %c0_i32_0 = arith.constant 0 : i32
    return %arg0, %c0_i32 : i32, i32
  }
  func.func @transform_1(%arg0: i32) -> (i32, i32) {
    %c0_i32 = arith.constant 0 : i32
    %c0_i32_0 = arith.constant 0 : i32
    %c0_i32_1 = arith.constant 0 : i32
    return %c0_i32, %c0_i32_0 : i32, i32
  }
  func.func @transform_2(%arg0: i32) -> (i32, i32) {
    %c0_i32 = arith.constant 0 : i32
    %c0_i32_0 = arith.constant 0 : i32
    %c0_i32_1 = arith.constant 0 : i32
    return %c0_i32, %c0_i32_0 : i32, i32
  }
  func.func @transform_3(%arg0: i32) -> (i32, i32) {
    %c0_i32 = arith.constant 0 : i32
    %c0_i32_0 = arith.constant 0 : i32
    %c0_i32_1 = arith.constant 0 : i32
    return %c0_i32, %c0_i32_0 : i32, i32
  }
  func.func @transform_4(%arg0: i32) -> (i32, i32) {
    %c0_i32 = arith.constant 0 : i32
    %c0_i32_0 = arith.constant 0 : i32
    %c0_i32_1 = arith.constant 0 : i32
    return %c0_i32, %c0_i32_0 : i32, i32
  }
  func.func @transform_5(%arg0: i32) -> (i32, i32) {
    %c0_i32 = arith.constant 0 : i32
    %c0_i32_0 = arith.constant 0 : i32
    %c0_i32_1 = arith.constant 0 : i32
    return %c0_i32, %c0_i32_0 : i32, i32
  }
  func.func @transform_6(%arg0: i32) -> (i32, i32) {
    %c0_i32 = arith.constant 0 : i32
    %c0_i32_0 = arith.constant 0 : i32
    %c0_i32_1 = arith.constant 0 : i32
    return %c0_i32, %c0_i32_0 : i32, i32
  }
  func.func @transform_7(%arg0: i32) -> (i32, i32) {
    %c0_i32 = arith.constant 0 : i32
    %c0_i32_0 = arith.constant 0 : i32
    return %c0_i32, %arg0 : i32, i32
  }
}

</mosaic_0001>

<bundles_post_ra>
// kernel: tpu_custom_call.1
= control target key start
LH: loop header
LB: loop body
LE: loop exit
PB: predicated region body
PF: predicated region fallthrough
CT: control target
= control target key end

     0   :  { %s1203_s0 = inlined_call_operand.vmem [shape: f32[256,16], index: 0, kind: input, shape index: {}]   ;;  %s1204_s1 = inlined_call_operand.vmem [shape: f32[32,16], index: 1, kind: input, shape index: {}]   ;;  %s1205_s2 = inlined_call_operand.vmem [shape: f32[32,1], index: 2, kind: input, shape index: {}]   ;;  %s1206_s3 = inlined_call_operand.vmem [shape: f32[32,32], index: 3, kind: input, shape index: {}]   ;;  %s1207_s4 = inlined_call_operand.vmem [shape: f32[32,1], index: 4, kind: input, shape index: {}]   ;;  %s1208_s5 = inlined_call_operand.vmem [shape: f32[32,1], index: 5, kind: input, shape index: {}]   ;;  %s1209_s6 = inlined_call_operand.<no memory space> [shape: f32[1,1], index: 6, kind: input, shape index: {}]   ;;  %s1210_s7 = inlined_call_operand.hbm [shape: f32[1,256], index: 7, kind: output, shape index: {}]  }
   0x1   :  { %v12_v0 = vstv %s1209_s6 }
   0x2   :  { %13 = vst [vmem:[#allocation2] sm:$0x1] %v12_v0 }
   0x3   :  { %14 = vsyncpa [#allocation4], 0 }
   0x4   :  { %16 = vsyncpa [#allocation4 + $0x1], 0  ;;  %s999_s26 = smov 0   ;;  %s1001_s27 = smov 0  }
   0x5   :  { %s1003_s28 = smov 0   ;;  %s1005_s29 = smov 0  }
   0x6 LB: > { %s720_s6 = sadd.s32 4294967295, %s952_s29   ;;  %s721_s30 = sadd.s32 4294967294, %s952_s29   ;;  %s952_s29 = sphi %s1005_s29, %s1216_s29   ;;  %s948_s28 = sphi %s1003_s28, %s1215_s28   ;;  %s944_s27 = sphi %s1001_s27, %s1214_s27   ;;  %s940_s26 = sphi %s999_s26, %s1213_s26  }
   0x7   : > { %s1022_s8 = sadd.s32 1, %s952_s29   ;;  %s181_s9 = sadd.s32 1, %s948_s28 }
   0x8   : > { %s178_s10 = ssub.s32 %s952_s29, %s1022_s8  ;;  %p191_p0 = scmp.ne.s32.totalorder %s948_s28, %s944_s27 }
   0x9   : > { %p179_p1 = scmp.eq.s32.totalorder %s178_s10, 0  ;;  %p192_p2 = scmp.eq.s32.totalorder %s720_s6, 1 }
   0xa   : > { %p197_p3 = scmp.ne.s32.totalorder %s944_s27, %s940_s26  ;;  %p198_p4 = scmp.eq.s32.totalorder %s721_s30, 1 }
   0xb   : > { %s1032_s11 = scalar_select %p179_p1, %s948_s28, %s181_s9  }
   0xc   : > { %p1034_p5 = por %p192_p2, %p191_p0  ;;  %p1038_p6 = por %p198_p4, %p197_p3 }
   0xd   : > { %p724_p7 = scmp.ge.s32.totalorder %s952_s29, 1  ;;  %p243_p8 = scmp.lt.s32.totalorder %s952_s29, 3 }
   0xf   : > { %p244_p9 = pnand %p724_p7, %p243_p8 }
  0x10   : > { %s1044_s14 = sshll.u32 (!%p244_p9), %s720_s6, 4  ;;  %s272_s16 = sand.u32 (!%p244_p9), 1, %s944_s27  }
  0x11   : > { %247 = sbr.rel (%p244_p9) target bundleno = 560 (0x230), region = 48  ;;  %p275_p10 = scmp.lt.s32.totalorder (!%p244_p9), %s1044_s14, 31 }
  0x12   : > { %s273_s17 = scalar_lea.vmem (!%p244_p9), [#allocation3], %s272_s16  ;;  %s955_s23 = smov (!%p244_p9), [#allocation3]  }
  0x13   : > { %s666_s18 = sshll.u32 (!%p244_p9), %s273_s17, 4  ;;  %s896_s24 = sshll.u32 (!%p244_p9), %s955_s23, 4  ;;  %s667_s18 = int_to_ptr.vmem [resolvable:$true] %s666_s18  ;;  %s897_s24 = int_to_ptr.vmem [resolvable:$false] %s896_s24 }
  0x14   : > { %s892_s22 = scalar_lea.vmem (!%p244_p9), %s667_s18, 16  ;;  %s898_s25 = scalar_lea.vmem (!%p244_p9), %s897_s24, 32 }
  0x15   : > { %p893_p11 = scmp.ne.s32.totalorder (!%p244_p9), %s667_s18, %s892_s22  ;;  %p899_p0 = scmp.lt.s32.totalorder (!%p244_p9), %s667_s18, %s897_s24 }
  0x16   : > { %vm324_vm0 = vcmask 130048   ;;  %v296_v1 = vld [vmem:[%s1204_s1] sm:$0xff]  ;;  %v954_v2 = vmov 0   ;;  %v303_v3 = vld [vmem:[%s1205_s2 + $0x18] sm:$0xff]  ;;  %v301_v4 = vld [vmem:[%s1205_s2 + $0x8] sm:$0xff]  ;;  %s276_s21 = scalar_select %p275_p10, %s1044_s14, 31 }
  0x17   : > { %814 = vmatprep.mubr.msk.f32.mxu0 %vm324_vm0, %v296_v1  ;;  %874 = vset.pattern.permute.xlu0 %v954_v2  ;;  %v302_v5 = vld [vmem:[%s1205_s2 + $0x10] sm:$0xff]  ;;  %v300_v6 = vld [vmem:[%s1205_s2] sm:$0xff]  ;;  %v479_v10 = vld [vmem:[%s1207_s4 + $0x8] sm:$0xff]  ;;  %vm502_vm1 = vcmask 261120   ;;  %p894_p12 = pnand %p893_p11, %p1034_p5  ;;  %p900_p1 = scmp.lt.s32.totalorder %s898_s25, %s892_s22 }
  0x18   : > { %321 = vperm.xlu0 %874, %v303_v3   ;;  %875 = vset.pattern.permute.xlu1 %v954_v2  ;;  %s726_s6 = sshll.u32 %s276_s21, 3  ;;  %v478_v9 = vld [vmem:[%s1207_s4] sm:$0xff]  ;;  %v480_v12 = vld [vmem:[%s1207_s4 + $0x10] sm:$0xff]  ;;  %v481_v13 = vld [vmem:[%s1207_s4 + $0x18] sm:$0xff]  ;;  %s664_s21 = scalar_lea.hbm %s1210_s7, %s1044_s14 }
  0x19   : > { %311 = vperm.xlu1 %875, %v301_v4   ;;  %s1067_s10 = scalar_lea.vmem %s1203_s0, %s726_s6  ;;  %v604_v15 = vld [vmem:[%s1208_s5] sm:$0xff]  ;;  %v605_v16 = vld [vmem:[%s1208_s5 + $0x8] sm:$0xff]  ;;  %v606_v18 = vld [vmem:[%s1208_s5 + $0x10] sm:$0xff]  ;;  %p895_p13 = pneg %p894_p12 }
  0x1a   : > { %v295_v7 = vld [vmem:[%s1067_s10 + $0x78] sm:$0xff]  ;;  %v294_v8 = vld [vmem:[%s1067_s10 + $0x70] sm:$0xff]  ;;  %v293_v11 = vld [vmem:[%s1067_s10 + $0x68] sm:$0xff]  ;;  %p901_p2 = por %p900_p1, %p899_p0 }
  0x1b   : > { %782 = vmatprep.subr.msk.mxu0 %vm324_vm0, %v295_v7  ;;  %v292_v14 = vld [vmem:[%s1067_s10 + $0x60] sm:$0xff]  ;;  %v291_v17 = vld [vmem:[%s1067_s10 + $0x58] sm:$0xff]  ;;  %v290_v20 = vld [vmem:[%s1067_s10 + $0x50] sm:$0xff] }
  0x1c   : > { %316 = vperm.xlu0 %874, %v302_v5   ;;  %783 = vmatpush3.xpose.msk.msra.mxu0 %vm324_vm0, %v295_v7  ;;  %v607_v19 = vld [vmem:[%s1208_s5 + $0x18] sm:$0xff]  ;;  %v641_v21 = vld [vmem:[#allocation2] sm:$0x1]  ;;  %v289_v22 = vld [vmem:[%s1067_s10 + $0x48] sm:$0xff]  ;;  %p902_p3 = pnand %p901_p2, %p895_p13 }
  0x1d   : > { %306 = vperm.xlu1 %875, %v300_v6   ;;  %784 = vmatprep.subr.msk.mxu0 %vm324_vm0, %v294_v8  ;;  %v288_v23 = vld [vmem:[%s1067_s10 + $0x40] sm:$0xff]  ;;  %v287_v24 = vld [vmem:[%s1067_s10 + $0x38] sm:$0xff]  ;;  %v286_v25 = vld [vmem:[%s1067_s10 + $0x30] sm:$0xff] }
  0x1e   : > { %v285_v26 = vld [vmem:[%s1067_s10 + $0x28] sm:$0xff]  ;;  %v284_v27 = vld [vmem:[%s1067_s10 + $0x20] sm:$0xff]  ;;  %v283_v28 = vld [vmem:[%s1067_s10 + $0x18] sm:$0xff] }
  0x1f   : > { %v282_v29 = vld [vmem:[%s1067_s10 + $0x10] sm:$0xff]  ;;  %v281_v30 = vld [vmem:[%s1067_s10 + $0x8] sm:$0xff]  ;;  %v280_v31 = vld [vmem:[%s1067_s10] sm:$0xff]  ;;  %s654_s10 = scalar_lea.sflag [#allocation4], %s272_s16 }
  0x20   : > { %484 = vperm.xlu0 %874, %v478_v9   ;;  %785 = vmatpush3.xpose.msk.msra.mxu0 %vm324_vm0, %v294_v8  ;;  %v297_v32 = vld [vmem:[%s1204_s1 + $0x8] sm:$0xff]  ;;  %v298_v33 = vld [vmem:[%s1204_s1 + $0x10] sm:$0xff]  ;;  %v299_v34 = vld [vmem:[%s1204_s1 + $0x18] sm:$0xff] }
  0x21   : > { %489 = vperm.xlu1 %875, %v479_v10   ;;  %786 = vmatprep.subr.msk.mxu0 %vm324_vm0, %v293_v11  ;;  %v474_v35 = vld [vmem:[%s1206_s3] sm:$0xff]  ;;  %v475_v52 = vld [vmem:[%s1206_s3 + $0x8] sm:$0xff]  ;;  %v476_v53 = vld [vmem:[%s1206_s3 + $0x10] sm:$0xff] }
  0x22   : > { %828 = vmatprep.mubr.msk.f32.mxu1 %vm502_vm1, %v474_v35  ;;  %v477_v54 = vld [vmem:[%s1206_s3 + $0x18] sm:$0xff] }
  0x24   : > { %494 = vperm.xlu0 %874, %v480_v12   ;;  %787 = vmatpush3.xpose.msk.msra.mxu0 %vm324_vm0, %v293_v11 }
  0x25   : > { %499 = vperm.xlu1 %875, %v481_v13   ;;  %788 = vmatprep.subr.msk.mxu0 %vm324_vm0, %v292_v14 }
  0x28   : > { %610 = vperm.xlu0 %874, %v604_v15   ;;  %789 = vmatpush3.xpose.msk.msra.mxu0 %vm324_vm0, %v292_v14 }
  0x29   : > { %615 = vperm.xlu1 %875, %v605_v16   ;;  %790 = vmatprep.subr.msk.mxu0 %vm324_vm0, %v291_v17 }
  0x2c   : > { %620 = vperm.xlu0 %874, %v606_v18   ;;  %791 = vmatpush3.xpose.msk.msra.mxu0 %vm324_vm0, %v291_v17  ;;  %v647_v17 = vlaneseq }
  0x2d   : > { %625 = vperm.xlu1 %875, %v607_v19   ;;  %792 = vmatprep.subr.msk.mxu0 %vm324_vm0, %v290_v20 }
  0x30   : > { %644 = vperm.xlu0 %874, %v641_v21   ;;  %793 = vmatpush3.xpose.msk.msra.mxu0 %vm324_vm0, %v290_v20  ;;  %v648_v20 = vshrl.u32 %v647_v17, 7 }
  0x31   : > { %794 = vmatprep.subr.msk.mxu0 %vm324_vm0, %v289_v22 }
  0x34   : > { %795 = vmatpush3.xpose.msk.msra.mxu0 %vm324_vm0, %v289_v22 }
  0x35   : > { %796 = vmatprep.subr.msk.mxu0 %vm324_vm0, %v288_v23 }
  0x38   : > { %797 = vmatpush3.xpose.msk.msra.mxu0 %vm324_vm0, %v288_v23  ;;  %v649_v23 = vsub.s32 0, %v648_v20 }
  0x39   : > { %798 = vmatprep.subr.msk.mxu0 %vm324_vm0, %v287_v24 }
  0x3c   : > { %799 = vmatpush3.xpose.msk.msra.mxu0 %vm324_vm0, %v287_v24 }
  0x3d   : > { %800 = vmatprep.subr.msk.mxu0 %vm324_vm0, %v286_v25 }
  0x40   : > { %801 = vmatpush3.xpose.msk.msra.mxu0 %vm324_vm0, %v286_v25 }
  0x41   : > { %802 = vmatprep.subr.msk.mxu0 %vm324_vm0, %v285_v26 }
  0x44   : > { %803 = vmatpush3.xpose.msk.msra.mxu0 %vm324_vm0, %v285_v26 }
  0x45   : > { %804 = vmatprep.subr.msk.mxu0 %vm324_vm0, %v284_v27 }
  0x48   : > { %805 = vmatpush3.xpose.msk.msra.mxu0 %vm324_vm0, %v284_v27 }
  0x49   : > { %806 = vmatprep.subr.msk.mxu0 %vm324_vm0, %v283_v28 }
  0x4c   : > { %807 = vmatpush3.xpose.msk.msra.mxu0 %vm324_vm0, %v283_v28 }
  0x4d   : > { %808 = vmatprep.subr.msk.mxu0 %vm324_vm0, %v282_v29 }
  0x50   : > { %809 = vmatpush3.xpose.msk.msra.mxu0 %vm324_vm0, %v282_v29 }
  0x51   : > { %810 = vmatprep.subr.msk.mxu0 %vm324_vm0, %v281_v30 }
  0x54   : > { %811 = vmatpush3.xpose.msk.msra.mxu0 %vm324_vm0, %v281_v30 }
  0x55   : > { %812 = vmatprep.subr.msk.mxu0 %vm324_vm0, %v280_v31 }
  0x58   : > { %813 = vmatpush3.xpose.msk.msra.mxu0 %vm324_vm0, %v280_v31 }
  0x5b   : > { %815 = vmatmul.mubr.msk.f32.vlgmr.msra.gmra.mxu0 %vm324_vm0, %v297_v32 }
  0x5c   : > { %817 = vmatprep.mubr.msk.f32.mxu0 %vm324_vm0, %v298_v33 }
  0x5f   : > { %818 = vmatmul.mubr.msk.f32.gmra.mxu0 %vm324_vm0, %v299_v34 }
  0x93   : > { %v322_v36 = vpop.permute.xlu0 %321 }
  0x94   : > { %v312_v38 = vpop.permute.xlu1 %311 }
  0x97   : > { %v317_v42 = vpop.permute.xlu0 %316 }
  0x98   : > { %v307_v46 = vpop.permute.xlu1 %306 }
  0x9b   : > { %v485_v56 = vpop.permute.xlu0 %484 }
  0x9c   : > { %v490_v55 = vpop.permute.xlu1 %489 }
  0x9f   : > { %v495_v0 = vpop.permute.xlu0 %494 }
  0xa0   : > { %v500_v61 = vpop.permute.xlu1 %499 }
  0xa3   : > { %v611_v3 = vpop.permute.xlu0 %610 }
  0xa4   : > { %v616_v6 = vpop.permute.xlu1 %615 }
  0xa7   : > { %v621_v11 = vpop.permute.xlu0 %620 }
  0xa8   : > { %v626_v14 = vpop.permute.xlu1 %625 }
  0xab   : > { %v645_v25 = vpop.permute.xlu0 %644 }
  0xac   : > { %v650_v27 = vrot.slane %v645_v25, %v649_v23 }
 0x11b   : > { %v816_v37 = vpop.f32.mrf.mxu0 }
 0x11c   : > { %v457_v44 = vadd.f32 %v816_v37, %v312_v38 }
 0x11d   : > { %v451_v39 = vpop.f32.mrf.mxu0 }
 0x11e   : > { %v452_v47 = vadd.f32 %v451_v39, %v307_v46 }
 0x11f   : > { %v819_v40 = vpop.f32.mrf.mxu0 }
 0x120   : > { %v467_v41 = vadd.f32 %v819_v40, %v322_v36 }
 0x121   : > { %v461_v43 = vpop.f32.mrf.mxu0 }
 0x122   : > { %876 = vtanh.f32 %v467_v41  ;;  %v462_v45 = vadd.f32 %v461_v43, %v317_v42 }
 0x124   : > { %878 = vtanh.f32 %v462_v45 }
 0x125   : > { %880 = vtanh.f32 %v457_v44 }
 0x126   : > { %882 = vtanh.f32 %v452_v47 }
 0x12f   : > { %v877_v48 = vpop.eup %876 }
 0x130   : > { %820 = vmatprep.subr.mxu1 %v877_v48 }
 0x131   : > { %v879_v49 = vpop.eup %878  ;;  %821 = vmatpush3.msra.mxu1 %v877_v48 }
 0x132   : > { %822 = vmatprep.subr.mxu1 %v879_v49  ;;  %v881_v50 = vpop.eup %880 }
 0x133   : > { %823 = vmatpush3.msra.mxu1 %v879_v49  ;;  %v883_v51 = vpop.eup %882 }
 0x134   : > { %824 = vmatprep.subr.mxu1 %v881_v50 }
 0x135   : > { %825 = vmatpush3.msra.mxu1 %v881_v50 }
 0x136   : > { %826 = vmatprep.subr.mxu1 %v883_v51 }
 0x137   : > { %827 = vmatpush3.msra.mxu1 %v883_v51 }
 0x138   : > { %829 = vmatmul.mubr.msk.f32.vlgmr.msra.gmra.mxu1 %vm502_vm1, %v475_v52 }
 0x139   : > { %831 = vmatprep.mubr.msk.f32.mxu1 %vm502_vm1, %v476_v53 }
 0x13c   : > { %832 = vmatmul.mubr.msk.f32.gmra.mxu1 %vm502_vm1, %v477_v54 }
 0x1f8   : > { %v830_v57 = vpop.f32.mrf.mxu1 }
 0x1f9   : > { %v587_v58 = vadd.f32 %v830_v57, %v490_v55 }
 0x1fa   : > { %v581_v59 = vpop.f32.mrf.mxu1 }
 0x1fb   : > { %v582_v60 = vadd.f32 %v581_v59, %v485_v56  ;;  %884 = vtanh.f32 %v587_v58 }
 0x1fc   : > { %v833_v62 = vpop.f32.mrf.mxu1 }
 0x1fd   : > { %886 = vtanh.f32 %v582_v60  ;;  %v597_v63 = vadd.f32 %v833_v62, %v500_v61 }
 0x1fe   : > { %v591_v1 = vpop.f32.mrf.mxu1 }
 0x1ff   : > { %v592_v2 = vadd.f32 %v591_v1, %v495_v0  ;;  %888 = vtanh.f32 %v597_v63 }
 0x201   : > { %890 = vtanh.f32 %v592_v2 }
 0x208   : > { %v885_v4 = vpop.eup %884 }
 0x209   : > { %v629_v9 = vmul.f32 %v885_v4, %v616_v6 }
 0x20a   : > { %v887_v5 = vpop.eup %886 }
 0x20b   : > { %v628_v7 = vmul.f32 %v887_v5, %v611_v3 }
 0x20c   : > { %v889_v8 = vpop.eup %888 }
 0x20d   : > { %v632_v12 = vadd.f32 %v629_v9, %v628_v7  ;;  %v631_v15 = vmul.f32 %v889_v8, %v626_v14 }
 0x20e   : > { %v891_v10 = vpop.eup %890 }
 0x20f   : > { %v630_v13 = vmul.f32 %v891_v10, %v621_v11 }
 0x211   : > { %v633_v16 = vadd.f32 %v632_v12, %v630_v13 }
 0x213   : > { %v634_v18 = vadd.f32 %v633_v16, %v631_v15 }
 0x215   : > { %v635_v19 = vrot.slane %v634_v18, 4 }
 0x217   : > { %v636_v21 = vadd.f32 %v635_v19, %v634_v18 }
 0x219   : > { %v637_v22 = vrot.slane %v636_v21, 2 }
 0x21b   : > { %v638_v24 = vadd.f32 %v637_v22, %v636_v21 }
 0x21d   : > { %v639_v26 = vrot.slane %v638_v24, 1 }
 0x21f   : > { %v640_v28 = vadd.f32 %v639_v26, %v638_v24 }
 0x221   : > { %v651_v29 = vadd.f32 %v650_v27, %v640_v28 }
 0x223   : > { %652 = vst [vmem:[%s273_s17] sm:$0x1] %v651_v29 }
 0x224   : > { %905 = shalt.err (!%p902_p3)
}
 0x225   : > { %s906_s6 = scalar_lea.hbm %s664_s21, 16  ;;  %s910_s9 = scalar_lea.hbm %s1210_s7, 32 }
 0x226   : > { %p907_p4 = scmp.ne.s32.totalorder %s664_s21, %s906_s6  ;;  %p911_p9 = scmp.lt.s32.totalorder %s664_s21, %s1210_s7 }
 0x227   : > { %p912_p10 = scmp.lt.s32.totalorder %s910_s9, %s906_s6 }
 0x228   : > { %p908_p7 = pnand %p907_p4, %p1034_p5 }
 0x229   : > { %p913_p11 = por %p912_p10, %p911_p9 }
 0x22a   : > { %p909_p8 = pneg %p908_p7 }
 0x22c   : > { %p914_p12 = pnand %p913_p11, %p909_p8 }
 0x22e   : > { %917 = shalt.err (!%p914_p12)
}
 0x22f   : > { %834 = dma.vmem_to_hbm [thread:$0]  (%p1034_p5), %s667_s18, 16, %s664_s21, %s654_s10  }
 0x230 PF: > { %p840_p13 = scmp.ge.s32.totalorder %s952_s29, 2  ;;  %s678_s17 = sand.u32 1, %s940_s26  }
 0x231   : > { %s679_s19 = scalar_lea.sflag [#allocation4], %s678_s17 }
 0x232   : > { %p837_p0 = pnand %p840_p13, %p1038_p6 }
 0x234   : > { %p838_p1 = pneg %p837_p0 }
 0x236   : > { %935 = dma.done.wait (%p838_p1), %s679_s19, 16  }
 0x237   : > { %937 = vsyncadd (%p838_p1), %s679_s19, 4294967280  ;;  %p19_p2 = scmp.ge.s32.totalorder %s1022_s8, 4   ;;  %s1213_s26 = smov %s944_s27 }
 0x238   : > { %s1214_s27 = smov %s948_s28  ;;  %s1215_s28 = smov %s1032_s11 }
 0x239   : > { %s1216_s29 = smov %s1022_s8  ;;  %21 = sbr.rel (!%p19_p2) target bundleno = 6 (0x6), region = 83 }
 0x23e   :  { %683 = vsyncpa [#allocation4], 1 }
 0x23f   :  { %685 = vsyncpa [#allocation4 + $0x1], 1 }

</bundles_post_ra>
